<compile_context>
chip_gen: v5e
topology: v5e:2x2
jax: 0.10.0
libtpu: 0.0.40
codegen_flags: <defaults>
</compile_context>

<pallas_src>
import math

import jax
import jax.numpy as jnp
from jax.experimental import pallas as pl
from jax.experimental.pallas import tpu as pltpu


def _round_up(x, m):
    return ((x + m - 1) // m) * m


def _vmem_capacity_bytes():
    try:
        return int(pltpu.get_tpu_info().vmem_capacity_bytes)
    except Exception:
        return 64 * 1024 * 1024  # conservative fallback (v7x per-TC size)


# --------------------------------------------------------------------------- #
# Kernel factory
# --------------------------------------------------------------------------- #
def _make_gcn_kernel(*, tk, n_valid, have_bias, direct_acc, resident_x):
    """Build the kernel body for one configuration (all args are static)."""
    ragged_k = (n_valid % tk) != 0

    def kernel(*refs):
        idx = 0
        adj_ref = refs[idx]; idx += 1
        x_ref = refs[idx]; idx += 1
        if have_bias:
            b_ref = refs[idx]; idx += 1
        o_ref = refs[idx]; idx += 1
        acc_ref = o_ref if direct_acc else refs[idx]

        k = pl.program_id(1)
        nk = pl.num_programs(1)

        @pl.when(k == 0)
        def _init():
            if have_bias:
                # Fused bias: initialize the accumulator with the bias row.
                acc_ref[...] = jnp.broadcast_to(
                    b_ref[...].astype(jnp.float32), acc_ref.shape
                )
            else:
                acc_ref[...] = jnp.zeros_like(acc_ref)

        a = adj_ref[...]
        if ragged_k:
            # Mask the ragged K tail of the (unpadded) adjacency so garbage
            # columns of the boundary block contribute exactly zero.
            col = jax.lax.broadcasted_iota(jnp.int32, a.shape, 1) + k * tk
            a = jnp.where(col < n_valid, a, jnp.zeros_like(a))

        if resident_x:
            start = pl.multiple_of(k * tk, tk)
            xk = x_ref[pl.ds(start, tk), :]
        else:
            xk = x_ref[...]

        acc_ref[...] += jnp.dot(a, xk, preferred_element_type=jnp.float32)

        if not direct_acc:
            @pl.when(k == nk - 1)
            def _fin():
                o_ref[...] = acc_ref[...].astype(o_ref.dtype)

    return kernel


# --------------------------------------------------------------------------- #
# Wrapper
# --------------------------------------------------------------------------- #
def graph_convolution(adj, x, bias=None, *, tm=None, tk=None):
    """output = adj @ x (+ bias).  adj: [N, N] dense, x: [N, F], bias: [F]."""
    N, N2 = adj.shape
    if N != N2:
        raise ValueError("adjacency must be square")
    Nx, F = x.shape
    if Nx != N:
        raise ValueError("adj / feature row mismatch")

    out_dtype = jnp.result_type(adj.dtype, x.dtype)
    direct_acc = out_dtype == jnp.float32  # accumulate straight into o_ref

    adj_isz = jnp.dtype(adj.dtype).itemsize
    x_isz = jnp.dtype(x.dtype).itemsize
    out_isz = jnp.dtype(out_dtype).itemsize

    F_pad = _round_up(F, 128)          # lane-dense (unmasked) output stores
    sub = max(8, 32 // adj_isz)        # sublane multiple: f32->8, bf16->16, i8->32

    vmem_cap = _vmem_capacity_bytes()
    tile_budget = vmem_cap // 2        # working-set budget for the pipeline

    # ---- tile selection (big tiles; adj tile ~2-4 MiB when N allows) ------ #
    if tm is None:
        tm = min(512, _round_up(N, sub))
    tm = max(sub, _round_up(tm, sub))
    if tk is None:
        tk = min(2048 if adj_isz <= 2 else 1024, _round_up(N, 128))
    tk = max(128, _round_up(tk, 128))

    def plan(tm_, tk_):
        nk_rows = _round_up(N, tk_)
        x_res_bytes = 2 * nk_rows * F_pad * x_isz   # constant-index block
        resident_ = x_res_bytes <= tile_budget // 2
        adj_buf = 2 * tm_ * tk_ * adj_isz
        out_buf = 2 * tm_ * F_pad * out_isz
        x_buf = x_res_bytes if resident_ else 2 * tk_ * F_pad * x_isz
        acc_buf = 0 if direct_acc else tm_ * F_pad * 4
        bias_buf = 0 if bias is None else 2 * F_pad * 4
        return resident_, nk_rows, adj_buf + out_buf + x_buf + acc_buf + bias_buf

    resident, Nk, foot = plan(tm, tk)
    while foot > tile_budget and tk > 128:
        tk = max(128, tk // 2)
        resident, Nk, foot = plan(tm, tk)
    while foot > tile_budget and tm > sub:
        tm = max(sub, _round_up(tm // 2, sub))
        resident, Nk, foot = plan(tm, tk)

    # ---- cheap (x-sized) operand prep; adjacency stays unpadded ----------- #
    x_p = x
    if (Nk, F_pad) != (N, F):
        x_p = jnp.pad(x, ((0, Nk - N), (0, F_pad - F)))

    have_bias = bias is not None
    if have_bias:
        b2d = bias.reshape(1, F).astype(jnp.float32)
        if F_pad != F:
            b2d = jnp.pad(b2d, ((0, 0), (0, F_pad - F)))

    grid = (pl.cdiv(N, tm), Nk // tk)

    adj_spec = pl.BlockSpec((tm, tk), lambda i, k: (i, k))
    if resident:
        # Constant block index => whole padded x is DMA'd once and stays
        # VMEM-resident; the kernel slices the K chunk itself.
        x_spec = pl.BlockSpec((Nk, F_pad), lambda i, k: (0, 0))
    else:
        x_spec = pl.BlockSpec((tk, F_pad), lambda i, k: (k, 0))
    out_spec = pl.BlockSpec((tm, F_pad), lambda i, k: (i, 0))
    out_shape = jax.ShapeDtypeStruct((N, F_pad), out_dtype)

    in_specs = [adj_spec, x_spec]
    operands = [adj, x_p]
    if have_bias:
        in_specs.append(pl.BlockSpec((1, F_pad), lambda i, k: (0, 0)))
        operands.append(b2d)

    scratch = [] if direct_acc else [pltpu.VMEM((tm, F_pad), jnp.float32)]

    # Real footprint + headroom, capped well below physical VMEM (64 MiB v7x).
    vmem_limit = min(int(0.75 * vmem_cap), foot + (12 << 20))

    x_bytes = (Nk * F_pad * x_isz) if resident else (grid[0] * Nk * F_pad * x_isz)
    cost = pl.CostEstimate(
        flops=2 * N * Nk * F_pad,
        transcendentals=0,
        bytes_accessed=N * N * adj_isz + x_bytes + N * F_pad * out_isz,
    )

    kernel = _make_gcn_kernel(
        tk=tk, n_valid=N, have_bias=have_bias,
        direct_acc=direct_acc, resident_x=resident,
    )

    out_p = pl.pallas_call(
        kernel,
        out_shape=out_shape,
        grid_spec=pltpu.PrefetchScalarGridSpec(
            num_scalar_prefetch=0,
            grid=grid,
            in_specs=in_specs,
            out_specs=out_spec,
            scratch_shapes=scratch,
        ),
        compiler_params=pltpu.CompilerParams(
            dimension_semantics=("parallel", "arbitrary"),
            vmem_limit_bytes=vmem_limit,
        ),
        cost_estimate=cost,
    )(*operands)

    if F_pad != F:
        out_p = out_p[:, :F]
    return out_p


# --------------------------------------------------------------------------- #
# Module mirror
# --------------------------------------------------------------------------- #
class GraphConvolutionPallas:
    """Mirror of the PyTorch module's parameter setup + forward."""

    def __init__(self, in_features, out_features, bias=True, *, key=None):
        self.in_features = in_features
        self.out_features = out_features
        if key is None:
            key = jax.random.PRNGKey(0)
        kw, kb = jax.random.split(key)
        stdv = 1.0 / math.sqrt(out_features)
        # self.weight is initialized but (exactly like the PyTorch forward)
        # never used in the forward computation.
        self.weight = jax.random.uniform(
            kw, (in_features, out_features), jnp.float32, minval=-stdv, maxval=stdv
        )
        if bias:
            self.bias = jax.random.uniform(
                kb, (out_features,), jnp.float32, minval=-stdv, maxval=stdv
            )
        else:
            self.bias = None

    def __call__(self, x, adj):
        return graph_convolution(adj, x, self.bias)


# --------------------------------------------------------------------------- #
# Test
# --------------------------------------------------------------------------- #
if __name__ == "__main__":
    key = jax.random.PRNGKey(0)
    k1, k2, k3 = jax.random.split(key, 3)

    in_features = 32    # ctor arg; unused by forward (matches PyTorch module)
    out_features = 32   # feature dim of x (== bias dim)
    hp = jax.lax.Precision.HIGHEST

    # Case 1: N not tile-aligned -> exercises unpadded-adjacency boundary
    # blocks + in-kernel K-tail masking + resident-x path + fused bias init.
    N = 200
    adj = jax.random.uniform(k1, (N, N), jnp.float32)
    x = jax.random.normal(k2, (N, out_features), jnp.float32)
    layer = GraphConvolutionPallas(in_features, out_features, bias=True, key=k3)

    ref = jnp.dot(adj, x, precision=hp) + layer.bias[None, :]
    out = jax.block_until_ready(layer(x, adj))
    assert out.shape == (N, out_features)
    assert jnp.allclose(out, ref, atol=1e-2, rtol=1e-3)

    # Case 2: explicit small tiles -> multi-step K accumulation into o_ref.
    N2 = 256
    adj2 = jax.random.uniform(k1, (N2, N2), jnp.float32)
    x2 = jax.random.normal(k2, (N2, out_features), jnp.float32)
    ref2 = jnp.dot(adj2, x2, precision=hp) + layer.bias[None, :]
    out2 = jax.block_until_ready(
        graph_convolution(adj2, x2, layer.bias, tm=64, tk=128)
    )
    assert jnp.allclose(out2, ref2, atol=1e-2, rtol=1e-3)

    # Case 3: no-bias variant.
    out3 = jax.block_until_ready(graph_convolution(adj2, x2, None, tm=64, tk=128))
    assert jnp.allclose(out3, jnp.dot(adj2, x2, precision=hp), atol=1e-2, rtol=1e-3)

    print("KERNEL_OK")
</pallas_src>

<mosaic_0001>
module attributes {stable_mosaic.version = 11 : i64} {
  func.func @kernel(%arg0: i32, %arg1: i32, %arg2: memref<200x256xf32, #tpu.memory_space<vmem>>, %arg3: memref<256x128xf32, #tpu.memory_space<vmem>>, %arg4: memref<1x128xf32, #tpu.memory_space<vmem>>, %arg5: memref<200x128xf32, #tpu.memory_space<vmem>>) attributes {dimension_semantics = [#tpu.dimension_semantics<parallel>, #tpu.dimension_semantics<arbitrary>], iteration_bounds = array<i64: 1, 1>, scalar_prefetch = 0 : i64, scratch_operands = 0 : i64, tpu.core_type = #tpu.core_type<tc>, window_params = [{transform_indices = @transform_0, window_bounds = array<i64: 200, 256>}, {pipeline_mode = #tpu.pipeline_mode<synchronous>, transform_indices = @transform_1, window_bounds = array<i64: 256, 128>}, {pipeline_mode = #tpu.pipeline_mode<synchronous>, transform_indices = @transform_2, window_bounds = array<i64: 1, 128>}, {transform_indices = @transform_3, window_bounds = array<i64: 200, 128>}]} {
    %c0_i32 = arith.constant 0 : i32
    %0 = arith.cmpi eq, %arg1, %c0_i32 : i32
    %1 = arith.extui %0 : i1 to i32
    %c0_i32_0 = arith.constant 0 : i32
    %2 = arith.cmpi ne, %1, %c0_i32_0 : i32
    scf.if %2 {
      %c0_9 = arith.constant 0 : index
      %c0_10 = arith.constant 0 : index
      %20 = vector.load %arg4[%c0_9, %c0_10] : memref<1x128xf32, #tpu.memory_space<vmem>>, vector<1x128xf32>
      %21 = vector.shape_cast %20 : vector<1x128xf32> to vector<1x128xf32>
      %22 = vector.broadcast %21 : vector<1x128xf32> to vector<200x128xf32>
      %c0_11 = arith.constant 0 : index
      %c0_12 = arith.constant 0 : index
      %23 = vector.load %arg5[%c0_11, %c0_12] : memref<200x128xf32, #tpu.memory_space<vmem>>, vector<200x128xf32>
      tpu.vector_store %arg5[%c0_11, %c0_12], %22 {strides = array<i32>} : memref<200x128xf32, #tpu.memory_space<vmem>>, vector<200x128xf32>,
    } else {
    }
    %c0 = arith.constant 0 : index
    %c0_1 = arith.constant 0 : index
    %3 = vector.load %arg2[%c0, %c0_1] : memref<200x256xf32, #tpu.memory_space<vmem>>, vector<200x256xf32>
    %4 = tpu.iota {dimensions = array<i32: 1>} : vector<200x256xi32>
    %c256_i32 = arith.constant 256 : i32
    %5 = arith.muli %arg1, %c256_i32 : i32
    %6 = vector.broadcast %5 : i32 to vector<200x256xi32>
    %7 = arith.addi %4, %6 : vector<200x256xi32>
    %c200_i32 = arith.constant 200 : i32
    %8 = vector.broadcast %c200_i32 : i32 to vector<200x256xi32>
    %9 = arith.cmpi slt, %7, %8 : vector<200x256xi32>
    %cst = arith.constant 0.000000e+00 : f32
    %10 = vector.broadcast %cst : f32 to vector<200x256xf32>
    %11 = arith.select %9, %3, %10 : vector<200x256xi1>, vector<200x256xf32>
    %c256_i32_2 = arith.constant 256 : i32
    %12 = arith.muli %arg1, %c256_i32_2 : i32
    %13 = tpu.assume_multiple %12, 256 : i32
    %14 = arith.index_cast %13 : i32 to index
    %c0_3 = arith.constant 0 : index
    %15 = vector.load %arg3[%14, %c0_3] : memref<256x128xf32, #tpu.memory_space<vmem>>, vector<256x128xf32>
    %c0_4 = arith.constant 0 : index
    %c0_5 = arith.constant 0 : index
    %16 = vector.load %arg5[%c0_4, %c0_5] : memref<200x128xf32, #tpu.memory_space<vmem>>, vector<200x128xf32>
    %cst_6 = arith.constant dense<0.000000e+00> : vector<200x128xf32>
    %17 = tpu.matmul %11, %15, %cst_6 {dimension_numbers = #tpu.dot_dimension_numbers<[1], [0], [0], [1], [0, 0, 1, 1], [], []>} : vector<200x256xf32>, vector<256x128xf32>, vector<200x128xf32> -> vector<200x128xf32>
    %18 = arith.addf %16, %17 : vector<200x128xf32>
    %c0_7 = arith.constant 0 : index
    %c0_8 = arith.constant 0 : index
    %19 = vector.load %arg5[%c0_7, %c0_8] : memref<200x128xf32, #tpu.memory_space<vmem>>, vector<200x128xf32>
    tpu.vector_store %arg5[%c0_7, %c0_8], %18 {strides = array<i32>} : memref<200x128xf32, #tpu.memory_space<vmem>>, vector<200x128xf32>,
    return
  }
  func.func @transform_0(%arg0: i32, %arg1: i32) -> (i32, i32) {
    %c0_i32 = arith.constant 0 : i32
    return %arg0, %arg1 : i32, i32
  }
  func.func @transform_1(%arg0: i32, %arg1: i32) -> (i32, i32) {
    %c0_i32 = arith.constant 0 : i32
    %c0_i32_0 = arith.constant 0 : i32
    %c0_i32_1 = arith.constant 0 : i32
    return %c0_i32, %c0_i32_0 : i32, i32
  }
  func.func @transform_2(%arg0: i32, %arg1: i32) -> (i32, i32) {
    %c0_i32 = arith.constant 0 : i32
    %c0_i32_0 = arith.constant 0 : i32
    %c0_i32_1 = arith.constant 0 : i32
    return %c0_i32, %c0_i32_0 : i32, i32
  }
  func.func @transform_3(%arg0: i32, %arg1: i32) -> (i32, i32) {
    %c0_i32 = arith.constant 0 : i32
    %c0_i32_0 = arith.constant 0 : i32
    return %arg0, %c0_i32 : i32, i32
  }
}

</mosaic_0001>

<bundles_post_ra>
// kernel: tpu_custom_call.1
= control target key start
LH: loop header
LB: loop body
LE: loop exit
PB: predicated region body
PF: predicated region fallthrough
CT: control target
= control target key end

     0   :  { %8 = vsyncpa [#allocation3], 0  ;;  %s772_s0 = inlined_call_operand.hbm [shape: f32[200,200], index: 0, kind: input, shape index: {}]   ;;  %s773_s1 = inlined_call_operand.hbm [shape: f32[256,128], index: 1, kind: input, shape index: {}]   ;;  %s774_s2 = inlined_call_operand.vmem [shape: f32[1,128], index: 2, kind: input, shape index: {}]   ;;  %s775_s3 = inlined_call_operand.hbm [shape: f32[200,128], index: 3, kind: output, shape index: {}]  }
   0x1   :  { %9 = vsyncpa [#allocation6], 0 }
   0x2   :  { %10 = vsyncpa [#allocation4], 0  ;;  %s15_s14 = sshll.u32 %s772_s0, 4  ;;  %s644_s15 = smov [#allocation2]   ;;  %s16_s14 = int_to_ptr.hbm [resolvable:$true] %s15_s14 }
   0x3   :  { %s17_s16 = sshll.u32 %s644_s15, 4  ;;  %s28_s19 = sshll.u32 %s773_s1, 4  ;;  %s18_s16 = int_to_ptr.vmem [resolvable:$true] %s17_s16  ;;  %s29_s19 = int_to_ptr.hbm [resolvable:$true] %s28_s19 }
   0x4   :  { %s645_s20 = smov 256   ;;  %s646_s21 = smov 16  }
   0x5   :  { %23 = dma.hbm_to_vmem [thread:$0]  %s16_s14, 6400, %s18_s16, [#allocation3], %s645_s20, %s645_s20, %s646_s21  }
   0x6   :  { %s647_s22 = smov [#allocation5]   ;;  %s648_s24 = smov 128  }
   0x7   :  { %s30_s23 = sshll.u32 %s647_s22, 4  ;;  %s649_s25 = smov 8   ;;  %s31_s23 = int_to_ptr.vmem [resolvable:$true] %s30_s23 }
   0x8   :  { %36 = dma.hbm_to_vmem [thread:$0]  %s29_s19, 4096, %s31_s23, [#allocation6], %s648_s24, %s648_s24, %s649_s25  }
   0x9   :  { %638 = dma.done.wait [#allocation3], 6400  }
   0xa   :  { %639 = vsyncadd [#allocation3], 4294960896 }
   0xb   :  { %640 = dma.done.wait [#allocation6], 4096  }
   0xc   :  { %641 = vsyncadd [#allocation6], 4294963200  ;;  %v205_v0 = vld [vmem:[#allocation5 + $0x78] sm:$0xff]  ;;  %v204_v2 = vld [vmem:[#allocation5 + $0x70] sm:$0xff]  ;;  %v130_v20 = vlaneseq  ;;  %s487_s29 = sshll.u32 %s775_s3, 4  ;;  %s488_s29 = int_to_ptr.hbm [resolvable:$true] %s487_s29 }
   0xd   :  { %v221_v1 = vld [vmem:[#allocation5 + $0xf8] sm:$0xff]  ;;  %526 = vmatpush.msra.mxu2 %v205_v0  ;;  %v220_v3 = vld [vmem:[#allocation5 + $0xf0] sm:$0xff]  ;;  %v203_v4 = vld [vmem:[#allocation5 + $0x68] sm:$0xff]  ;;  %247 = vmatpush.msra.mxu0 %v205_v0 }
   0xe   :  { %339 = vmatpush.msra.mxu1 %v221_v1  ;;  %v219_v5 = vld [vmem:[#allocation5 + $0xe8] sm:$0xff]  ;;  %542 = vmatpush.msra.mxu3 %v221_v1  ;;  %v202_v6 = vld [vmem:[#allocation5 + $0x60] sm:$0xff]  ;;  %v201_v8 = vld [vmem:[#allocation5 + $0x58] sm:$0xff]  ;;  %v131_v25 = vand.u32 127, %v130_v20 }
   0xf   :  { %527 = vmatpush.msra.mxu2 %v204_v2  ;;  %v218_v7 = vld [vmem:[#allocation5 + $0xe0] sm:$0xff]  ;;  %248 = vmatpush.msra.mxu0 %v204_v2  ;;  %v217_v9 = vld [vmem:[#allocation5 + $0xd8] sm:$0xff]  ;;  %v200_v10 = vld [vmem:[#allocation5 + $0x50] sm:$0xff] }
  0x10   :  { %340 = vmatpush.msra.mxu1 %v220_v3  ;;  %543 = vmatpush.msra.mxu3 %v220_v3  ;;  %v216_v11 = vld [vmem:[#allocation5 + $0xd0] sm:$0xff]  ;;  %v199_v12 = vld [vmem:[#allocation5 + $0x48] sm:$0xff]  ;;  %v198_v14 = vld [vmem:[#allocation5 + $0x40] sm:$0xff]  ;;  %v680_v30 = vadd.s32 128, %v131_v25 }
  0x11   :  { %528 = vmatpush.msra.mxu2 %v203_v4  ;;  %249 = vmatpush.msra.mxu0 %v203_v4  ;;  %v215_v13 = vld [vmem:[#allocation5 + $0xc8] sm:$0xff]  ;;  %v214_v15 = vld [vmem:[#allocation5 + $0xc0] sm:$0xff]  ;;  %v197_v16 = vld [vmem:[#allocation5 + $0x38] sm:$0xff] }
  0x12   :  { %341 = vmatpush.msra.mxu1 %v219_v5  ;;  %544 = vmatpush.msra.mxu3 %v219_v5  ;;  %v213_v17 = vld [vmem:[#allocation5 + $0xb8] sm:$0xff]  ;;  %v196_v18 = vld [vmem:[#allocation5 + $0x30] sm:$0xff]  ;;  %v195_v21 = vld [vmem:[#allocation5 + $0x28] sm:$0xff]  ;;  %vm138_vm0 = vcmp.lt.s32.totalorder %v680_v30, 200 }
  0x13   :  { %529 = vmatpush.msra.mxu2 %v202_v6  ;;  %250 = vmatpush.msra.mxu0 %v202_v6  ;;  %v212_v19 = vld [vmem:[#allocation5 + $0xb0] sm:$0xff]  ;;  %v211_v22 = vld [vmem:[#allocation5 + $0xa8] sm:$0xff]  ;;  %v194_v23 = vld [vmem:[#allocation5 + $0x20] sm:$0xff] }
  0x14   :  { %342 = vmatpush.msra.mxu1 %v218_v7  ;;  %545 = vmatpush.msra.mxu3 %v218_v7  ;;  %v210_v24 = vld [vmem:[#allocation5 + $0xa0] sm:$0xff]  ;;  %v193_v26 = vld [vmem:[#allocation5 + $0x18] sm:$0xff]  ;;  %v192_v28 = vld [vmem:[#allocation5 + $0x10] sm:$0xff] }
  0x15   :  { %530 = vmatpush.msra.mxu2 %v201_v8  ;;  %251 = vmatpush.msra.mxu0 %v201_v8  ;;  %v209_v27 = vld [vmem:[#allocation5 + $0x98] sm:$0xff]  ;;  %v208_v29 = vld [vmem:[#allocation5 + $0x90] sm:$0xff]  ;;  %v191_v31 = vld [vmem:[#allocation5 + $0x8] sm:$0xff] }
  0x16   :  { %343 = vmatpush.msra.mxu1 %v217_v9  ;;  %546 = vmatpush.msra.mxu3 %v217_v9  ;;  %v207_v32 = vld [vmem:[#allocation5 + $0x88] sm:$0xff]  ;;  %v190_v33 = vld [vmem:[#allocation5] sm:$0xff]  ;;  %v104_v35 = vld [vmem:[#allocation2 + $0xc0] sm:$0xff] }
  0x17   :  { %531 = vmatpush.msra.mxu2 %v200_v10  ;;  %252 = vmatpush.msra.mxu0 %v200_v10  ;;  %v206_v34 = vld [vmem:[#allocation5 + $0x80] sm:$0xff]  ;;  %v81_v36 = vld [vmem:[#allocation2 + $0x8] sm:$0xff]  ;;  %v80_v37 = vld [vmem:[#allocation2] sm:$0xff] }
  0x18   :  { %344 = vmatpush.msra.mxu1 %v216_v11  ;;  %547 = vmatpush.msra.mxu3 %v216_v11  ;;  %v107_v38 = vld [vmem:[#allocation2 + $0xd8] sm:$0xff]  ;;  %v106_v39 = vld [vmem:[#allocation2 + $0xd0] sm:$0xff]  ;;  %v109_v42 = vld [vmem:[#allocation2 + $0xe8] sm:$0xff] }
  0x19   :  { %532 = vmatpush.msra.mxu2 %v199_v12  ;;  %253 = vmatpush.msra.mxu0 %v199_v12  ;;  %v83_v40 = vld [vmem:[#allocation2 + $0x18] sm:$0xff]  ;;  %v82_v41 = vld [vmem:[#allocation2 + $0x10] sm:$0xff]  ;;  %v108_v43 = vld [vmem:[#allocation2 + $0xe0] sm:$0xff] }
  0x1a   :  { %345 = vmatpush.msra.mxu1 %v215_v13  ;;  %548 = vmatpush.msra.mxu3 %v215_v13  ;;  %v85_v44 = vld [vmem:[#allocation2 + $0x28] sm:$0xff]  ;;  %v84_v45 = vld [vmem:[#allocation2 + $0x20] sm:$0xff]  ;;  %v111_v46 = vld [vmem:[#allocation2 + $0xf8] sm:$0xff] }
  0x1b   :  { %533 = vmatpush.msra.mxu2 %v198_v14  ;;  %254 = vmatpush.msra.mxu0 %v198_v14  ;;  %v110_v47 = vld [vmem:[#allocation2 + $0xf0] sm:$0xff]  ;;  %v87_v48 = vld [vmem:[#allocation2 + $0x38] sm:$0xff]  ;;  %v113_v50 = vld [vmem:[#allocation2 + $0x108] sm:$0xff] }
  0x1c   :  { %346 = vmatpush.msra.mxu1 %v214_v15  ;;  %549 = vmatpush.msra.mxu3 %v214_v15  ;;  %v86_v49 = vld [vmem:[#allocation2 + $0x30] sm:$0xff]  ;;  %v112_v51 = vld [vmem:[#allocation2 + $0x100] sm:$0xff]  ;;  %v89_v52 = vld [vmem:[#allocation2 + $0x48] sm:$0xff] }
  0x1d   :  { %534 = vmatpush.msra.mxu2 %v197_v16  ;;  %255 = vmatpush.msra.mxu0 %v197_v16  ;;  %v88_v53 = vld [vmem:[#allocation2 + $0x40] sm:$0xff]  ;;  %v115_v54 = vld [vmem:[#allocation2 + $0x118] sm:$0xff]  ;;  %v114_v55 = vld [vmem:[#allocation2 + $0x110] sm:$0xff] }
  0x1e   :  { %347 = vmatpush.msra.mxu1 %v213_v17  ;;  %550 = vmatpush.msra.mxu3 %v213_v17  ;;  %v91_v56 = vld [vmem:[#allocation2 + $0x58] sm:$0xff]  ;;  %v90_v57 = vld [vmem:[#allocation2 + $0x50] sm:$0xff]  ;;  %v117_v58 = vld [vmem:[#allocation2 + $0x128] sm:$0xff] }
  0x1f   :  { %535 = vmatpush.msra.mxu2 %v196_v18  ;;  %256 = vmatpush.msra.mxu0 %v196_v18  ;;  %v116_v59 = vld [vmem:[#allocation2 + $0x120] sm:$0xff]  ;;  %v93_v60 = vld [vmem:[#allocation2 + $0x68] sm:$0xff]  ;;  %v119_v62 = vld [vmem:[#allocation2 + $0x138] sm:$0xff] }
  0x20   :  { %348 = vmatpush.msra.mxu1 %v212_v19  ;;  %551 = vmatpush.msra.mxu3 %v212_v19  ;;  %v92_v61 = vld [vmem:[#allocation2 + $0x60] sm:$0xff]  ;;  %v118_v63 = vld [vmem:[#allocation2 + $0x130] sm:$0xff]  ;;  %v95_v0 = vld [vmem:[#allocation2 + $0x78] sm:$0xff] }
  0x21   :  { %536 = vmatpush.msra.mxu2 %v195_v21  ;;  %257 = vmatpush.msra.mxu0 %v195_v21  ;;  %v94_v1 = vld [vmem:[#allocation2 + $0x70] sm:$0xff]  ;;  %v121_v2 = vld [vmem:[#allocation2 + $0x148] sm:$0xff]  ;;  %v120_v3 = vld [vmem:[#allocation2 + $0x140] sm:$0xff] }
  0x22   :  { %349 = vmatpush.msra.mxu1 %v211_v22  ;;  %552 = vmatpush.msra.mxu3 %v211_v22  ;;  %v97_v4 = vld [vmem:[#allocation2 + $0x88] sm:$0xff]  ;;  %v96_v5 = vld [vmem:[#allocation2 + $0x80] sm:$0xff]  ;;  %v123_v6 = vld [vmem:[#allocation2 + $0x158] sm:$0xff] }
  0x23   :  { %537 = vmatpush.msra.mxu2 %v194_v23  ;;  %258 = vmatpush.msra.mxu0 %v194_v23  ;;  %v122_v7 = vld [vmem:[#allocation2 + $0x150] sm:$0xff]  ;;  %v99_v8 = vld [vmem:[#allocation2 + $0x98] sm:$0xff]  ;;  %v125_v10 = vld [vmem:[#allocation2 + $0x168] sm:$0xff] }
  0x24   :  { %350 = vmatpush.msra.mxu1 %v210_v24  ;;  %553 = vmatpush.msra.mxu3 %v210_v24  ;;  %v98_v9 = vld [vmem:[#allocation2 + $0x90] sm:$0xff]  ;;  %v124_v11 = vld [vmem:[#allocation2 + $0x160] sm:$0xff]  ;;  %v101_v12 = vld [vmem:[#allocation2 + $0xa8] sm:$0xff] }
  0x25   :  { %538 = vmatpush.msra.mxu2 %v193_v26  ;;  %259 = vmatpush.msra.mxu0 %v193_v26  ;;  %v100_v13 = vld [vmem:[#allocation2 + $0xa0] sm:$0xff]  ;;  %v127_v14 = vld [vmem:[#allocation2 + $0x178] sm:$0xff]  ;;  %v126_v15 = vld [vmem:[#allocation2 + $0x170] sm:$0xff] }
  0x26   :  { %351 = vmatpush.msra.mxu1 %v209_v27  ;;  %554 = vmatpush.msra.mxu3 %v209_v27  ;;  %v103_v16 = vld [vmem:[#allocation2 + $0xb8] sm:$0xff]  ;;  %v102_v17 = vld [vmem:[#allocation2 + $0xb0] sm:$0xff]  ;;  %v129_v18 = vld [vmem:[#allocation2 + $0x188] sm:$0xff] }
  0x27   :  { %539 = vmatpush.msra.mxu2 %v192_v28  ;;  %260 = vmatpush.msra.mxu0 %v192_v28  ;;  %v128_v19 = vld [vmem:[#allocation2 + $0x180] sm:$0xff]  ;;  %v105_v20 = vld [vmem:[#allocation2 + $0xc8] sm:$0xff] }
  0x28   :  { %352 = vmatpush.msra.mxu1 %v208_v29  ;;  %555 = vmatpush.msra.mxu3 %v208_v29  ;;  %v736_v22 = vld [vmem:[%s774_s2] ss:$0 sm:$0xff]  ;;  %s650_s2 = smov [#allocation7]  }
  0x29   :  { %540 = vmatpush.msra.mxu2 %v191_v31  ;;  %261 = vmatpush.msra.mxu0 %v191_v31  ;;  %s485_s26 = sshll.u32 %s650_s2, 4  ;;  %s486_s26 = int_to_ptr.vmem [resolvable:$true] %s485_s26 }
  0x2a   :  { %353 = vmatpush.msra.mxu1 %v207_v32  ;;  %556 = vmatpush.msra.mxu3 %v207_v32 }
  0x2b   :  { %541 = vmatpush.msra.mxu2 %v190_v33  ;;  %262 = vmatpush.msra.mxu0 %v190_v33 }
  0x2c   :  { %354 = vmatpush.msra.mxu1 %v206_v34  ;;  %299 = vmatmul.f32.vlgmr.msra.gmra.mxu2 %v104_v35 }
  0x2d   :  { %501 = vmatmul.msk.f32.vlgmr.msra.gmra.mxu1 %vm138_vm0, %v81_v36  ;;  %557 = vmatpush.msra.mxu3 %v206_v34 }
  0x2e   :  { %263 = vmatmul.f32.vlgmr.msra.gmra.mxu0 %v80_v37  ;;  %514 = vmatmul.msk.f32.vlgmr.msra.gmra.mxu3 %vm138_vm0, %v107_v38 }
  0x34   :  { %302 = vmatmul.f32.gmra.mxu2 %v106_v39 }
  0x35   :  { %502 = vmatmul.msk.f32.gmra.mxu1 %vm138_vm0, %v83_v40 }
  0x36   :  { %266 = vmatmul.f32.gmra.mxu0 %v82_v41  ;;  %515 = vmatmul.msk.f32.gmra.mxu3 %vm138_vm0, %v109_v42 }
  0x3c   :  { %305 = vmatmul.f32.gmra.mxu2 %v108_v43 }
  0x3d   :  { %503 = vmatmul.msk.f32.gmra.mxu1 %vm138_vm0, %v85_v44 }
  0x3e   :  { %269 = vmatmul.f32.gmra.mxu0 %v84_v45  ;;  %516 = vmatmul.msk.f32.gmra.mxu3 %vm138_vm0, %v111_v46 }
  0x44   :  { %308 = vmatmul.f32.gmra.mxu2 %v110_v47 }
  0x45   :  { %504 = vmatmul.msk.f32.gmra.mxu1 %vm138_vm0, %v87_v48 }
  0x46   :  { %272 = vmatmul.f32.gmra.mxu0 %v86_v49  ;;  %517 = vmatmul.msk.f32.gmra.mxu3 %vm138_vm0, %v113_v50 }
  0x4c   :  { %311 = vmatmul.f32.gmra.mxu2 %v112_v51 }
  0x4d   :  { %505 = vmatmul.msk.f32.gmra.mxu1 %vm138_vm0, %v89_v52 }
  0x4e   :  { %275 = vmatmul.f32.gmra.mxu0 %v88_v53  ;;  %518 = vmatmul.msk.f32.gmra.mxu3 %vm138_vm0, %v115_v54 }
  0x54   :  { %314 = vmatmul.f32.gmra.mxu2 %v114_v55 }
  0x55   :  { %506 = vmatmul.msk.f32.gmra.mxu1 %vm138_vm0, %v91_v56 }
  0x56   :  { %278 = vmatmul.f32.gmra.mxu0 %v90_v57  ;;  %519 = vmatmul.msk.f32.gmra.mxu3 %vm138_vm0, %v117_v58 }
  0x5c   :  { %317 = vmatmul.f32.gmra.mxu2 %v116_v59 }
  0x5d   :  { %507 = vmatmul.msk.f32.gmra.mxu1 %vm138_vm0, %v93_v60 }
  0x5e   :  { %281 = vmatmul.f32.gmra.mxu0 %v92_v61  ;;  %520 = vmatmul.msk.f32.gmra.mxu3 %vm138_vm0, %v119_v62 }
  0x64   :  { %320 = vmatmul.f32.gmra.mxu2 %v118_v63 }
  0x65   :  { %508 = vmatmul.msk.f32.gmra.mxu1 %vm138_vm0, %v95_v0 }
  0x66   :  { %284 = vmatmul.f32.gmra.mxu0 %v94_v1  ;;  %521 = vmatmul.msk.f32.gmra.mxu3 %vm138_vm0, %v121_v2 }
  0x6c   :  { %323 = vmatmul.f32.gmra.mxu2 %v120_v3 }
  0x6d   :  { %509 = vmatmul.msk.f32.gmra.mxu1 %vm138_vm0, %v97_v4 }
  0x6e   :  { %287 = vmatmul.f32.gmra.mxu0 %v96_v5  ;;  %522 = vmatmul.msk.f32.gmra.mxu3 %vm138_vm0, %v123_v6 }
  0x74   :  { %326 = vmatmul.f32.gmra.mxu2 %v122_v7 }
  0x75   :  { %510 = vmatmul.msk.f32.gmra.mxu1 %vm138_vm0, %v99_v8 }
  0x76   :  { %290 = vmatmul.f32.gmra.mxu0 %v98_v9  ;;  %523 = vmatmul.msk.f32.gmra.mxu3 %vm138_vm0, %v125_v10 }
  0x7c   :  { %329 = vmatmul.f32.gmra.mxu2 %v124_v11 }
  0x7d   :  { %511 = vmatmul.msk.f32.gmra.mxu1 %vm138_vm0, %v101_v12 }
  0x7e   :  { %293 = vmatmul.f32.gmra.mxu0 %v100_v13  ;;  %524 = vmatmul.msk.f32.gmra.mxu3 %vm138_vm0, %v127_v14 }
  0x84   :  { %332 = vmatmul.f32.gmra.mxu2 %v126_v15 }
  0x85   :  { %512 = vmatmul.msk.f32.gmra.mxu1 %vm138_vm0, %v103_v16 }
  0x86   :  { %296 = vmatmul.f32.gmra.mxu0 %v102_v17  ;;  %525 = vmatmul.msk.f32.gmra.mxu3 %vm138_vm0, %v129_v18 }
  0x8c   :  { %335 = vmatmul.f32.gmra.mxu2 %v128_v19 }
  0x8d   :  { %513 = vmatmul.msk.f32.gmra.mxu1 %vm138_vm0, %v105_v20 }
  0xaa   :  { %v356_v21 = vpop.f32.mrf.mxu1 }
  0xab   :  { %v264_v23 = vpop.f32.mrf.mxu0 }
  0xac   :  { %v357_v24 = vadd.f32 %v356_v21, %v264_v23 }
  0xae   :  { %v431_v25 = vadd.f32 %v736_v22, %v357_v24 }
  0xaf   :  { %v739_v26 = vpop.f32.mrf.mxu2 }
  0xb0   :  { %456 = vst [vmem:[#allocation7] sm:$0xff] %v431_v25 }
  0xb1   :  { %v395_v28 = vpop.f32.mrf.mxu3 }
  0xb2   :  { %v359_v27 = vpop.f32.mrf.mxu1 }
  0xb3   :  { %v267_v29 = vpop.f32.mrf.mxu0 }
  0xb4   :  { %v360_v31 = vadd.f32 %v359_v27, %v267_v29 }
  0xb6   :  { %v432_v30 = vadd.f32 %v736_v22, %v360_v31 }
  0xb7   :  { %v303_v32 = vpop.f32.mrf.mxu2 }
  0xb8   :  { %457 = vst [vmem:[#allocation7 + $0x8] sm:$0xff] %v432_v30  ;;  %v396_v33 = vadd.f32 %v395_v28, %v303_v32 }
  0xb9   :  { %v398_v35 = vpop.f32.mrf.mxu3 }
  0xba   :  { %v362_v34 = vpop.f32.mrf.mxu1  ;;  %v444_v36 = vadd.f32 %v736_v22, %v396_v33 }
  0xbb   :  { %v270_v37 = vpop.f32.mrf.mxu0 }
  0xbc   :  { %469 = vst [vmem:[#allocation7 + $0x68] sm:$0xff] %v444_v36  ;;  %v363_v38 = vadd.f32 %v362_v34, %v270_v37 }
  0xbe   :  { %v433_v39 = vadd.f32 %v736_v22, %v363_v38 }
  0xbf   :  { %v306_v40 = vpop.f32.mrf.mxu2 }
  0xc0   :  { %458 = vst [vmem:[#allocation7 + $0x10] sm:$0xff] %v433_v39  ;;  %v399_v41 = vadd.f32 %v398_v35, %v306_v40 }
  0xc1   :  { %v401_v43 = vpop.f32.mrf.mxu3 }
  0xc2   :  { %v365_v42 = vpop.f32.mrf.mxu1  ;;  %v445_v44 = vadd.f32 %v736_v22, %v399_v41 }
  0xc3   :  { %v273_v45 = vpop.f32.mrf.mxu0 }
  0xc4   :  { %470 = vst [vmem:[#allocation7 + $0x70] sm:$0xff] %v445_v44  ;;  %v366_v46 = vadd.f32 %v365_v42, %v273_v45 }
  0xc6   :  { %v434_v47 = vadd.f32 %v736_v22, %v366_v46 }
  0xc7   :  { %v309_v48 = vpop.f32.mrf.mxu2 }
  0xc8   :  { %459 = vst [vmem:[#allocation7 + $0x18] sm:$0xff] %v434_v47  ;;  %v402_v49 = vadd.f32 %v401_v43, %v309_v48 }
  0xc9   :  { %v404_v51 = vpop.f32.mrf.mxu3 }
  0xca   :  { %v368_v50 = vpop.f32.mrf.mxu1  ;;  %v446_v52 = vadd.f32 %v736_v22, %v402_v49 }
  0xcb   :  { %v276_v53 = vpop.f32.mrf.mxu0 }
  0xcc   :  { %471 = vst [vmem:[#allocation7 + $0x78] sm:$0xff] %v446_v52  ;;  %v369_v54 = vadd.f32 %v368_v50, %v276_v53 }
  0xce   :  { %v435_v55 = vadd.f32 %v736_v22, %v369_v54 }
  0xcf   :  { %v312_v56 = vpop.f32.mrf.mxu2 }
  0xd0   :  { %460 = vst [vmem:[#allocation7 + $0x20] sm:$0xff] %v435_v55  ;;  %v405_v57 = vadd.f32 %v404_v51, %v312_v56 }
  0xd1   :  { %v407_v59 = vpop.f32.mrf.mxu3 }
  0xd2   :  { %v371_v58 = vpop.f32.mrf.mxu1  ;;  %v447_v60 = vadd.f32 %v736_v22, %v405_v57 }
  0xd3   :  { %v279_v61 = vpop.f32.mrf.mxu0 }
  0xd4   :  { %472 = vst [vmem:[#allocation7 + $0x80] sm:$0xff] %v447_v60  ;;  %v372_v62 = vadd.f32 %v371_v58, %v279_v61 }
  0xd6   :  { %v436_v63 = vadd.f32 %v736_v22, %v372_v62 }
  0xd7   :  { %v315_v0 = vpop.f32.mrf.mxu2 }
  0xd8   :  { %461 = vst [vmem:[#allocation7 + $0x28] sm:$0xff] %v436_v63  ;;  %v408_v1 = vadd.f32 %v407_v59, %v315_v0 }
  0xd9   :  { %v410_v3 = vpop.f32.mrf.mxu3 }
  0xda   :  { %v374_v2 = vpop.f32.mrf.mxu1  ;;  %v448_v4 = vadd.f32 %v736_v22, %v408_v1 }
  0xdb   :  { %v282_v5 = vpop.f32.mrf.mxu0 }
  0xdc   :  { %473 = vst [vmem:[#allocation7 + $0x88] sm:$0xff] %v448_v4  ;;  %v375_v6 = vadd.f32 %v374_v2, %v282_v5 }
  0xde   :  { %v437_v7 = vadd.f32 %v736_v22, %v375_v6 }
  0xdf   :  { %v318_v8 = vpop.f32.mrf.mxu2 }
  0xe0   :  { %462 = vst [vmem:[#allocation7 + $0x30] sm:$0xff] %v437_v7  ;;  %v411_v9 = vadd.f32 %v410_v3, %v318_v8 }
  0xe1   :  { %v413_v11 = vpop.f32.mrf.mxu3 }
  0xe2   :  { %v377_v10 = vpop.f32.mrf.mxu1  ;;  %v449_v12 = vadd.f32 %v736_v22, %v411_v9 }
  0xe3   :  { %v285_v13 = vpop.f32.mrf.mxu0 }
  0xe4   :  { %474 = vst [vmem:[#allocation7 + $0x90] sm:$0xff] %v449_v12  ;;  %v378_v14 = vadd.f32 %v377_v10, %v285_v13 }
  0xe6   :  { %v438_v15 = vadd.f32 %v736_v22, %v378_v14 }
  0xe7   :  { %v321_v16 = vpop.f32.mrf.mxu2 }
  0xe8   :  { %463 = vst [vmem:[#allocation7 + $0x38] sm:$0xff] %v438_v15  ;;  %v414_v17 = vadd.f32 %v413_v11, %v321_v16 }
  0xe9   :  { %v416_v19 = vpop.f32.mrf.mxu3 }
  0xea   :  { %v380_v18 = vpop.f32.mrf.mxu1  ;;  %v450_v20 = vadd.f32 %v736_v22, %v414_v17 }
  0xeb   :  { %v288_v21 = vpop.f32.mrf.mxu0 }
  0xec   :  { %475 = vst [vmem:[#allocation7 + $0x98] sm:$0xff] %v450_v20  ;;  %v381_v23 = vadd.f32 %v380_v18, %v288_v21 }
  0xee   :  { %v439_v24 = vadd.f32 %v736_v22, %v381_v23 }
  0xef   :  { %v324_v25 = vpop.f32.mrf.mxu2 }
  0xf0   :  { %464 = vst [vmem:[#allocation7 + $0x40] sm:$0xff] %v439_v24  ;;  %v417_v27 = vadd.f32 %v416_v19, %v324_v25 }
  0xf1   :  { %v419_v29 = vpop.f32.mrf.mxu3 }
  0xf2   :  { %v383_v28 = vpop.f32.mrf.mxu1  ;;  %v451_v31 = vadd.f32 %v736_v22, %v417_v27 }
  0xf3   :  { %v291_v30 = vpop.f32.mrf.mxu0 }
  0xf4   :  { %476 = vst [vmem:[#allocation7 + $0xa0] sm:$0xff] %v451_v31  ;;  %v384_v32 = vadd.f32 %v383_v28, %v291_v30 }
  0xf6   :  { %v440_v33 = vadd.f32 %v736_v22, %v384_v32 }
  0xf7   :  { %v327_v34 = vpop.f32.mrf.mxu2 }
  0xf8   :  { %465 = vst [vmem:[#allocation7 + $0x48] sm:$0xff] %v440_v33  ;;  %v420_v35 = vadd.f32 %v419_v29, %v327_v34 }
  0xf9   :  { %v422_v37 = vpop.f32.mrf.mxu3 }
  0xfa   :  { %v386_v36 = vpop.f32.mrf.mxu1  ;;  %v452_v38 = vadd.f32 %v736_v22, %v420_v35 }
  0xfb   :  { %v294_v39 = vpop.f32.mrf.mxu0 }
  0xfc   :  { %477 = vst [vmem:[#allocation7 + $0xa8] sm:$0xff] %v452_v38  ;;  %v387_v40 = vadd.f32 %v386_v36, %v294_v39 }
  0xfe   :  { %v441_v41 = vadd.f32 %v736_v22, %v387_v40 }
  0xff   :  { %v330_v42 = vpop.f32.mrf.mxu2 }
 0x100   :  { %466 = vst [vmem:[#allocation7 + $0x50] sm:$0xff] %v441_v41  ;;  %v423_v43 = vadd.f32 %v422_v37, %v330_v42 }
 0x101   :  { %v425_v47 = vpop.f32.mrf.mxu3 }
 0x102   :  { %v389_v44 = vpop.f32.mrf.mxu1  ;;  %v453_v45 = vadd.f32 %v736_v22, %v423_v43 }
 0x103   :  { %v297_v46 = vpop.f32.mrf.mxu0 }
 0x104   :  { %478 = vst [vmem:[#allocation7 + $0xb0] sm:$0xff] %v453_v45  ;;  %v390_v48 = vadd.f32 %v389_v44, %v297_v46 }
 0x106   :  { %v442_v49 = vadd.f32 %v736_v22, %v390_v48 }
 0x107   :  { %v333_v50 = vpop.f32.mrf.mxu2 }
 0x108   :  { %467 = vst [vmem:[#allocation7 + $0x58] sm:$0xff] %v442_v49  ;;  %v426_v51 = vadd.f32 %v425_v47, %v333_v50 }
 0x109   :  { %v428_v56 = vpop.f32.mrf.mxu3 }
 0x10a   :  { %v392_v52 = vpop.f32.mrf.mxu1  ;;  %v454_v53 = vadd.f32 %v736_v22, %v426_v51 }
 0x10b   :  { %v393_v54 = vadd.f32 %v392_v52, %v739_v26 }
 0x10c   :  { %479 = vst [vmem:[#allocation7 + $0xb8] sm:$0xff] %v454_v53 }
 0x10d   :  { %v443_v55 = vadd.f32 %v736_v22, %v393_v54 }
 0x10f   :  { %468 = vst [vmem:[#allocation7 + $0x60] sm:$0xff] %v443_v55  ;;  %v336_v57 = vpop.f32.mrf.mxu2 }
 0x110   :  { %v429_v58 = vadd.f32 %v428_v56, %v336_v57 }
 0x112   :  { %v455_v59 = vadd.f32 %v736_v22, %v429_v58 }
 0x114   :  { %480 = vst [vmem:[#allocation7 + $0xc0] sm:$0xff] %v455_v59 }
 0x115   :  { %493 = dma.vmem_to_hbm [thread:$0]  %s486_s26, 3200, %s488_s29, [#allocation4], %s648_s24, %s648_s24, %s649_s25  }
 0x116   :  { %642 = dma.done.wait [#allocation4], 3200  }
 0x117   :  { %643 = vsyncadd [#allocation4], 4294964096 }
 0x118   :  { %498 = vsyncpa [#allocation3], 1 }
 0x119   :  { %499 = vsyncpa [#allocation6], 1 }
 0x11a   :  { %500 = vsyncpa [#allocation4], 1 }

</bundles_post_ra>
